<compile_context>
chip_gen: v7x
topology: tpu7x:2x2x1
jax: 0.10.0
libtpu: 0.0.40
codegen_flags: <defaults>
</compile_context>

<pallas_src>
import functools
import math

import jax
import jax.numpy as jnp
from jax import lax
from jax.experimental import pallas as pl
from jax.experimental.pallas import tpu as pltpu


def _round_up(x: int, m: int) -> int:
    return ((x + m - 1) // m) * m


def _make_kernel(loss_type: str, spans, lcols: int, rows_total: int,
                 tile_rows: int):
    """Kernel computing, per row-tile, the partial sum of loss(pred, gt) for
    every feature span in `spans`.  Each span gets its own (8, 128) output
    block filled with the tile's partial sum."""

    ragged = (rows_total % tile_rows) != 0

    def kernel(pred_ref, gt_ref, *out_refs):
        p = pred_ref[...].astype(jnp.float32)
        g = gt_ref[...].astype(jnp.float32)
        d = p - g

        if loss_type == "l1":
            per_elem = jnp.abs(d)
        elif loss_type == "l2":
            per_elem = d * d
        elif loss_type == "l1_smooth":
            # torch.nn.SmoothL1Loss, default beta = 1.0
            absd = jnp.abs(d)
            per_elem = jnp.where(absd < 1.0, 0.5 * d * d, absd - 0.5)
        else:
            raise ValueError(f"unknown loss type: {loss_type}")

        if ragged:
            # Last grid step over-reads past row R: mask those rows to zero
            # BEFORE the row reduction.  For full tiles rows_left >= tile_rows
            # so the mask is all-true (cheap VPU filler under the DMA).
            rows_left = rows_total - pl.program_id(0) * tile_rows
            row_idx = lax.broadcasted_iota(jnp.int32, per_elem.shape, 0)
            per_elem = jnp.where(row_idx < rows_left, per_elem, 0.0)

        # Reduce over rows first -> tiny (1, lcols) vector; span masking then
        # costs O(lcols) instead of O(tile).
        col_sums = jnp.sum(per_elem, axis=0, keepdims=True)

        needs_iota = any((s > 0) or (e < lcols) for (s, e) in spans)
        col = (lax.broadcasted_iota(jnp.int32, col_sums.shape, 1)
               if needs_iota else None)

        for (s, e), o_ref in zip(spans, out_refs):
            if s == 0 and e == lcols:
                masked = col_sums
            else:
                masked = jnp.where((col >= s) & (col < e), col_sums, 0.0)
            partial = jnp.sum(masked)
            # Lane-dense (8, 128) block per grid step; wrapper reads [0, 0].
            o_ref[...] = jnp.broadcast_to(partial, (8, 128)).astype(jnp.float32)

    return kernel


@functools.partial(jax.jit, static_argnames=("loss_type", "spans"))
def _recons_loss(pred, gt, *, loss_type: str, spans):
    """Mean(loss(pred[..., s:e], gt[..., s:e])) for each (s, e) in `spans`,
    computed in a single pass over the data."""
    assert pred.shape == gt.shape, (pred.shape, gt.shape)
    D = pred.shape[-1]
    R = math.prod(pred.shape[:-1]) if pred.ndim > 1 else 1

    # Clamp spans to the actual feature dim (matches torch slicing behavior)
    # and reject empty spans (torch would return NaN from an empty mean).
    spans = tuple((max(0, min(s, D)), min(e, D)) for (s, e) in spans)
    for (s, e) in spans:
        if e <= s:
            raise ValueError(f"empty feature span {(s, e)}: mean is undefined")
    max_end = max(e for _, e in spans)

    # Restrict streamed lanes to the minimal 128-multiple covering the spans
    # (block's last dim must be a multiple of 128 or the full D).
    if D > 128 and _round_up(max_end, 128) < D:
        lcols = _round_up(max_end, 128)
    else:
        lcols = D

    pred2d = pred.reshape(R, D)
    gt2d = gt.reshape(R, D)

    # ---- Row-tile sizing -------------------------------------------------
    # Budget covers: 2 inputs x 2 pipeline buffers (itemsize) plus ~2 f32
    # intermediate tiles per row.  Always a multiple of 16 rows (bf16 sublane
    # packing), capped at 4096 rows and at round_up(R, 16).
    itemsize = jnp.dtype(pred.dtype).itemsize
    budget = 16 * 1024 * 1024
    per_row_bytes = 2 * 2 * lcols * itemsize + 2 * lcols * 4
    tr = budget // per_row_bytes
    tr = max(16, min(4096, (tr // 16) * 16))
    tr = min(tr, _round_up(R, 16))
    # For medium-sized inputs, prefer several grid steps (pipeline overlap and
    # v7x's two TensorCores both get work on the "parallel" axis), but don't
    # shrink tiles below 512 rows just to split small inputs.
    if R >= 2 * 512:
        tr = min(tr, max(512, _round_up(pl.cdiv(R, 8), 16)))

    grid = pl.cdiv(R, tr)
    kernel = _make_kernel(loss_type, spans, lcols, R, tr)

    # Explicit scoped-VMEM limit sized from the actual buffers (+ margin for
    # extra f32 temporaries); keeps v5e's 16 MiB default from binding while
    # staying well under v7x's 64 MiB physical VMEM.
    vmem_bytes = 4 * tr * lcols * itemsize + 3 * tr * lcols * 4 + (2 << 20)
    vmem_limit = int(min(max(vmem_bytes, 8 << 20), 30 << 20))

    out_shapes = tuple(jax.ShapeDtypeStruct((grid * 8, 128), jnp.float32)
                       for _ in spans)
    out_specs = tuple(pl.BlockSpec((8, 128), lambda i: (i, 0)) for _ in spans)

    outs = pl.pallas_call(
        kernel,
        out_shape=out_shapes,
        grid_spec=pltpu.PrefetchScalarGridSpec(
            num_scalar_prefetch=0,
            grid=(grid,),
            in_specs=[pl.BlockSpec((tr, lcols), lambda i: (i, 0)),
                      pl.BlockSpec((tr, lcols), lambda i: (i, 0))],
            out_specs=out_specs,
        ),
        compiler_params=pltpu.CompilerParams(
            dimension_semantics=("parallel",),
            vmem_limit_bytes=vmem_limit),
    )(pred2d, gt2d)

    losses = []
    for (s, e), o in zip(spans, outs):
        count = R * (e - s)
        partials = o.reshape(grid, 8, 128)[:, 0, 0]   # one partial per tile
        losses.append(jnp.sum(partials) / jnp.float32(count))
    return tuple(losses)


class ReConsLossPallas:
    """JAX/Pallas port of ReConsLoss (no learnable parameters)."""

    def __init__(self, recons_loss: str, nb_joints: int):
        assert recons_loss in ("l1", "l2", "l1_smooth")
        self.loss_type = recons_loss
        self.nb_joints = nb_joints
        # 4 global motion features + (nb_joints - 1)*12 local + 3 + 4
        self.motion_dim = (nb_joints - 1) * 12 + 4 + 3 + 4

    def forward(self, motion_pred, motion_gt):
        (loss,) = _recons_loss(motion_pred, motion_gt,
                               loss_type=self.loss_type,
                               spans=((0, self.motion_dim),))
        return loss

    __call__ = forward

    def forward_joint(self, motion_pred, motion_gt):
        end = (self.nb_joints - 1) * 3 + 4
        (loss,) = _recons_loss(motion_pred, motion_gt,
                               loss_type=self.loss_type,
                               spans=((4, end),))
        return loss

    def forward_both(self, motion_pred, motion_gt):
        """Fused: (full-motion loss, joint loss) from a single pass over the
        data — use this when both terms are needed in the same train step."""
        end = (self.nb_joints - 1) * 3 + 4
        return _recons_loss(motion_pred, motion_gt,
                            loss_type=self.loss_type,
                            spans=((0, self.motion_dim), (4, end)))


# ---------------------------------------------------------------------------
# Pure-JAX reference (for correctness checks only)
# ---------------------------------------------------------------------------
def _ref_loss(pred, gt, loss_type, start, end):
    p = pred[..., start:end].astype(jnp.float32)
    g = gt[..., start:end].astype(jnp.float32)
    d = p - g
    if loss_type == "l1":
        return jnp.mean(jnp.abs(d))
    if loss_type == "l2":
        return jnp.mean(d * d)
    absd = jnp.abs(d)
    return jnp.mean(jnp.where(absd < 1.0, 0.5 * d * d, absd - 0.5))


def _check(name, got, want, rtol=1e-5, atol=1e-5):
    ok = bool(jnp.allclose(got, want, rtol=rtol, atol=atol))
    if not ok:
        print(f"MISMATCH {name}: got {got} want {want}")
    return ok


if __name__ == "__main__":
    key = jax.random.PRNGKey(0)
    k1, k2, k3, k4, k5, k6 = jax.random.split(key, 6)
    ok = True

    # --- Case 1: nb_joints=4 (motion_dim=47), small f32 batch, D < 128 ----
    nb_joints = 4
    B, S, D = 2, 8, 64
    pred = jax.random.normal(k1, (B, S, D), dtype=jnp.float32)
    gt = jax.random.normal(k2, (B, S, D), dtype=jnp.float32)
    jend = (nb_joints - 1) * 3 + 4

    for loss_type in ("l1", "l2", "l1_smooth"):
        mod = ReConsLossPallas(loss_type, nb_joints)
        out_full = jax.block_until_ready(mod.forward(pred, gt))
        out_joint = jax.block_until_ready(mod.forward_joint(pred, gt))
        fused_full, fused_joint = jax.block_until_ready(mod.forward_both(pred, gt))

        ref_full = _ref_loss(pred, gt, loss_type, 0, mod.motion_dim)
        ref_joint = _ref_loss(pred, gt, loss_type, 4, jend)

        ok &= _check(f"{loss_type}/forward", out_full, ref_full)
        ok &= _check(f"{loss_type}/forward_joint", out_joint, ref_joint)
        ok &= _check(f"{loss_type}/fused_full", fused_full, ref_full)
        ok &= _check(f"{loss_type}/fused_joint", fused_joint, ref_joint)

    # --- Case 2: nb_joints=22 (motion_dim=263), exercises lane restriction
    #     for forward_joint and a single ragged tile (R=14, block rows=16) --
    nb_joints2 = 22
    B2, S2, D2 = 2, 7, 263
    pred2 = jax.random.normal(k3, (B2, S2, D2), dtype=jnp.float32)
    gt2 = jax.random.normal(k4, (B2, S2, D2), dtype=jnp.float32)
    jend2 = (nb_joints2 - 1) * 3 + 4

    mod2 = ReConsLossPallas("l1_smooth", nb_joints2)
    out2_full = jax.block_until_ready(mod2.forward(pred2, gt2))
    out2_joint = jax.block_until_ready(mod2.forward_joint(pred2, gt2))
    ok &= _check("j22/forward", out2_full,
                 _ref_loss(pred2, gt2, "l1_smooth", 0, mod2.motion_dim))
    ok &= _check("j22/forward_joint", out2_joint,
                 _ref_loss(pred2, gt2, "l1_smooth", 4, jend2))

    # --- Case 3: multi-step grid with ragged last tile (R=1200, tr=512) ----
    B3, S3, D3 = 4, 300, 263
    pred3 = jax.random.normal(k5, (B3, S3, D3), dtype=jnp.float32)
    gt3 = jax.random.normal(k6, (B3, S3, D3), dtype=jnp.float32)
    mod3 = ReConsLossPallas("l2", nb_joints2)
    f3_full, f3_joint = jax.block_until_ready(mod3.forward_both(pred3, gt3))
    ok &= _check("grid/fused_full", f3_full,
                 _ref_loss(pred3, gt3, "l2", 0, mod3.motion_dim))
    ok &= _check("grid/fused_joint", f3_joint,
                 _ref_loss(pred3, gt3, "l2", 4, jend2))

    # --- Case 4: bf16 inputs (f32 cast stays inside the kernel) -----------
    pred_bf = pred.astype(jnp.bfloat16)
    gt_bf = gt.astype(jnp.bfloat16)
    mod_bf = ReConsLossPallas("l2", nb_joints)
    out_bf = jax.block_until_ready(mod_bf.forward(pred_bf, gt_bf))
    ok &= _check("bf16/forward", out_bf,
                 _ref_loss(pred_bf, gt_bf, "l2", 0, mod_bf.motion_dim),
                 rtol=1e-4, atol=1e-4)

    if ok:
        print("KERNEL_OK")
</pallas_src>

<mosaic_0001>
module attributes {stable_mosaic.version = 11 : i64} {
  func.func @kernel(%arg0: i32, %arg1: memref<16x64xf32, #tpu.memory_space<vmem>>, %arg2: memref<16x64xf32, #tpu.memory_space<vmem>>, %arg3: memref<8x128xf32, #tpu.memory_space<vmem>>) attributes {dimension_semantics = [#tpu.dimension_semantics<parallel>], iteration_bounds = array<i64: 1>, scalar_prefetch = 0 : i64, scratch_operands = 0 : i64, tpu.core_type = #tpu.core_type<tc>, window_params = [{transform_indices = @transform_0, window_bounds = array<i64: 16, 64>}, {transform_indices = @transform_1, window_bounds = array<i64: 16, 64>}, {transform_indices = @transform_2, window_bounds = array<i64: 8, 128>}]} {
    %c0 = arith.constant 0 : index
    %c0_0 = arith.constant 0 : index
    %0 = vector.load %arg1[%c0, %c0_0] : memref<16x64xf32, #tpu.memory_space<vmem>>, vector<16x64xf32>
    %c0_1 = arith.constant 0 : index
    %c0_2 = arith.constant 0 : index
    %1 = vector.load %arg2[%c0_1, %c0_2] : memref<16x64xf32, #tpu.memory_space<vmem>>, vector<16x64xf32>
    %2 = arith.subf %0, %1 : vector<16x64xf32>
    %3 = math.absf %2 : vector<16x64xf32>
    %cst = arith.constant dense<0.000000e+00> : vector<64xf32>
    %4 = vector.multi_reduction <add>, %3, %cst [0] : vector<16x64xf32> to vector<64xf32>
    %5 = vector.shape_cast %4 : vector<64xf32> to vector<1x64xf32>
    %6 = tpu.iota {dimensions = array<i32: 1>} : vector<1x64xi32>
    %c0_i32 = arith.constant 0 : i32
    %7 = vector.broadcast %c0_i32 : i32 to vector<1x64xi32>
    %8 = arith.cmpi sge, %6, %7 : vector<1x64xi32>
    %c47_i32 = arith.constant 47 : i32
    %9 = vector.broadcast %c47_i32 : i32 to vector<1x64xi32>
    %10 = arith.cmpi slt, %6, %9 : vector<1x64xi32>
    %11 = arith.andi %8, %10 : vector<1x64xi1>
    %cst_3 = arith.constant 0.000000e+00 : f32
    %12 = vector.broadcast %cst_3 : f32 to vector<1x64xf32>
    %13 = arith.select %11, %5, %12 : vector<1x64xi1>, vector<1x64xf32>
    %14 = vector.shape_cast %13 : vector<1x64xf32> to vector<1x1x64xf32>
    %cst_4 = arith.constant dense<0.000000e+00> : vector<1xf32>
    %15 = vector.multi_reduction <add>, %14, %cst_4 [1, 2] : vector<1x1x64xf32> to vector<1xf32>
    %16 = vector.shape_cast %15 : vector<1xf32> to vector<1x1x1xf32>
    %17 = vector.extract %16[0, 0, 0] : f32 from vector<1x1x1xf32>
    %18 = vector.broadcast %17 : f32 to vector<8x128xf32>
    %c0_5 = arith.constant 0 : index
    %c0_6 = arith.constant 0 : index
    %19 = vector.load %arg3[%c0_5, %c0_6] : memref<8x128xf32, #tpu.memory_space<vmem>>, vector<8x128xf32>
    tpu.vector_store %arg3[%c0_5, %c0_6], %18 {strides = array<i32>} : memref<8x128xf32, #tpu.memory_space<vmem>>, vector<8x128xf32>,
    return
  }
  func.func @transform_0(%arg0: i32) -> (i32, i32) {
    %c0_i32 = arith.constant 0 : i32
    %c0_i32_0 = arith.constant 0 : i32
    return %arg0, %c0_i32 : i32, i32
  }
  func.func @transform_1(%arg0: i32) -> (i32, i32) {
    %c0_i32 = arith.constant 0 : i32
    %c0_i32_0 = arith.constant 0 : i32
    return %arg0, %c0_i32 : i32, i32
  }
  func.func @transform_2(%arg0: i32) -> (i32, i32) {
    %c0_i32 = arith.constant 0 : i32
    %c0_i32_0 = arith.constant 0 : i32
    return %arg0, %c0_i32 : i32, i32
  }
}

</mosaic_0001>

<bundles_post_ra>
// kernel: _recons_loss.1
= control target key start
LH: loop header
LB: loop body
LE: loop exit
PB: predicated region body
PF: predicated region fallthrough
CT: control target
= control target key end

     0   :  { %7 = vsyncpa [#allocation3], 0  ;;  %s182_s0 = inlined_call_operand.hbm [shape: f32[16,64], index: 0, kind: input, shape index: {}]   ;;  %s183_s1 = inlined_call_operand.hbm [shape: f32[16,64], index: 1, kind: input, shape index: {}]   ;;  %s184_s2 = inlined_call_operand.vmem [shape: f32[8,128], index: 2, kind: output, shape index: {}]  }
   0x1   :  { %8 = vsyncpa [#allocation5], 0  ;;  %s136_s9 = smov [#allocation2]   ;;  %s88_s13 = scalar_lea.hbm %s182_s0, 256 }
   0x2   :  { %s14_s10 = sshll.u32 %s136_s9, 4  ;;  %p89_p0 = scmp.ne.s32.totalorder %s182_s0, %s88_s13  ;;  %s15_s10 = int_to_ptr.vmem [resolvable:$true] %s14_s10 }
   0x3   :  { %p92_p1 = scmp.lt.u32.totalorder %s88_s13, %s182_s0 }
   0x5   :  { %p94_p2 = pnand %p92_p1, %p89_p0 }
   0x7   :  { %97 = shalt.err (!%p94_p2)
}
   0x8   :  { %s98_s18 = scalar_lea.vmem %s15_s10, 256  ;;  %p103_p4 = scmp.lt.s32.totalorder %s15_s10, %s15_s10 }
   0x9   :  { %p99_p3 = scmp.ne.s32.totalorder %s15_s10, %s98_s18  ;;  %p104_p5 = scmp.lt.s32.totalorder %s98_s18, %s98_s18 }
   0xb   :  { %p105_p6 = por %p104_p5, %p103_p4 }
   0xd   :  { %p106_p7 = pnand %p105_p6, %p99_p3 }
   0xf   :  { %109 = shalt.err (!%p106_p7)
}
  0x10   :  { %s137_s19 = smov 128   ;;  %s138_s20 = smov 8  }
  0x11   :  { %20 = dma.hbm_to_vmem [thread:$0]  %s182_s0, 256, %s15_s10, [#allocation3], %s137_s19, %s137_s19, %s138_s20  }
  0x12   :  { %s139_s23 = smov [#allocation4]   ;;  %s110_s27 = scalar_lea.hbm %s183_s1, 256 }
  0x13   :  { %s26_s24 = sshll.u32 %s139_s23, 4  ;;  %p111_p8 = scmp.ne.s32.totalorder %s183_s1, %s110_s27  ;;  %s27_s24 = int_to_ptr.vmem [resolvable:$true] %s26_s24 }
  0x14   :  { %p114_p9 = scmp.lt.u32.totalorder %s110_s27, %s183_s1 }
  0x16   :  { %p116_p10 = pnand %p114_p9, %p111_p8 }
  0x18   :  { %119 = shalt.err (!%p116_p10)
}
  0x19   :  { %s120_s4 = scalar_lea.vmem %s27_s24, 256  ;;  %p125_p12 = scmp.lt.s32.totalorder %s27_s24, %s27_s24 }
  0x1a   :  { %p121_p11 = scmp.ne.s32.totalorder %s27_s24, %s120_s4  ;;  %p126_p13 = scmp.lt.s32.totalorder %s120_s4, %s120_s4 }
  0x1c   :  { %p127_p0 = por %p126_p13, %p125_p12 }
  0x1e   :  { %p128_p1 = pnand %p127_p0, %p121_p11 }
  0x20   :  { %131 = shalt.err (!%p128_p1)
}
  0x21   :  { %32 = dma.hbm_to_vmem [thread:$0]  %s183_s1, 256, %s27_s24, [#allocation5], %s137_s19, %s137_s19, %s138_s20  }
  0x22   :  { %132 = dma.done.wait [#allocation3], 256  }
  0x23   :  { %133 = vsyncadd [#allocation3], 4294967040 }
  0x24   :  { %134 = dma.done.wait [#allocation5], 256  }
  0x25   :  { %135 = vsyncadd [#allocation5], 4294967040  ;;  %v39_v0 = vld [vmem:[#allocation2] sm:$0xff]  ;;  %v40_v1 = vld [vmem:[#allocation2 + $0x8] sm:$0xff]  ;;  %vm47_vm0 = vcmask 523264   ;;  %v57_v12 = vlaneseq  ;;  %vm63_vm2 = vcmask 516096  }
  0x26   :  { %v41_v2 = vld [vmem:[#allocation4] sm:$0xff]  ;;  %v42_v3 = vld [vmem:[#allocation4 + $0x8] sm:$0xff] }
  0x27   :  { %v43_v4 = vsub.f32 %v39_v0, %v41_v2  ;;  %v44_v5 = vsub.f32 %v40_v1, %v42_v3  ;;  %v58_v15 = vand.u32 127, %v57_v12 }
  0x29   :  { %v45_v6 = vand.u32 2147483647, %v43_v4  ;;  %v46_v7 = vand.u32 2147483647, %v44_v5  ;;  %vm60_vm1 = vcmp.lt.s32.totalorder %v58_v15, 47 }
  0x2b   :  { %v48_v8 = vsel %vm47_vm0, %v45_v6, 0.0  ;;  %v49_v9 = vsel %vm47_vm0, %v46_v7, 0.0 }
  0x2c   :  { %v50_v10 = vadd.f32 %v49_v9, %v48_v8 }
  0x2e   :  { %v51_v11 = vrot.slane %v50_v10, 4 }
  0x30   :  { %v52_v13 = vadd.f32 %v51_v11, %v50_v10 }
  0x32   :  { %v53_v14 = vrot.slane %v52_v13, 2 }
  0x34   :  { %v54_v16 = vadd.f32 %v53_v14, %v52_v13 }
  0x36   :  { %v55_v17 = vrot.slane %v54_v16, 1 }
  0x38   :  { %v56_v18 = vadd.f32 %v55_v17, %v54_v16 }
  0x3a   :  { %v62_v19 = vsel %vm60_vm1, %v56_v18, 0.0 }
  0x3b   :  { %v64_v20 = vsel %vm63_vm2, %v62_v19, 0.0 }
  0x3c   :  { %65 = vadd.xlane.f32.xlu0 %v64_v20 }
  0xc9   :  { %v66_v21 = vpop.xlane.xlu0 %65 }
  0xca   :  { %v67_v22 = vrot.slane %v66_v21, 4 }
  0xcc   :  { %v68_v23 = vadd.f32 %v67_v22, %v66_v21 }
  0xce   :  { %v69_v24 = vrot.slane %v68_v23, 2 }
  0xd0   :  { %v70_v25 = vadd.f32 %v69_v24, %v68_v23 }
  0xd2   :  { %v71_v26 = vrot.slane %v70_v25, 1 }
  0xd4   :  { %v72_v27 = vadd.f32 %v71_v26, %v70_v25 }
  0xd6   :  { %82 = vpush %v72_v27 }
 0x107   :  { %s83_s1 = spop %82 }
 0x108   :  { %v74_v28 = vstv %s83_s1 }
 0x109   :  { %75 = vst [vmem:[%s184_s2] sm:$0xff] %v74_v28 }
 0x10a   :  { %80 = vsyncpa [#allocation3], 1 }
 0x10b   :  { %81 = vsyncpa [#allocation5], 1 }

</bundles_post_ra>
